<compile_context>
chip_gen: v5e
topology: v5e:2x2
jax: 0.10.0
libtpu: 0.0.40
codegen_flags: <defaults>
</compile_context>

<pallas_src>
import math

import jax
import jax.numpy as jnp
from jax.experimental import pallas as pl
from jax.experimental.pallas import tpu as pltpu

to_dim = 5
from_dim = 6
latent_dim = 10

_MAX_TILE_M = 1024  # sweep 1024-2048; ~5 MiB double-buffered VMEM at 1024 (f32)


def _round_up(x, m):
    return (x + m - 1) // m * m


def _sublane(dtype):
    # dtype-aware second-to-last-dim granule: f32 -> 8, bf16 -> 16, int8/fp8 -> 32
    return max(8, 32 // jnp.dtype(dtype).itemsize)


def _fused_qkv_kernel(xt_ref, xf_ref, qw_ref, kw_ref, vw_ref,
                      qb_ref, kb_ref, vb_ref, q_ref, k_ref, v_ref):
    # xt: (TM, to_dim)   @ qw (to_dim, D)   + qb -> Q (TM, D)
    # xf: (TM, from_dim) @ kw/vw            + b  -> K, V (TM, D)
    xt = xt_ref[...]
    xf = xf_ref[...]
    q = jnp.dot(xt, qw_ref[...], preferred_element_type=jnp.float32) + qb_ref[...]
    k = jnp.dot(xf, kw_ref[...], preferred_element_type=jnp.float32) + kb_ref[...]
    v = jnp.dot(xf, vw_ref[...], preferred_element_type=jnp.float32) + vb_ref[...]
    q_ref[...] = q.astype(q_ref.dtype)
    k_ref[...] = k.astype(k_ref.dtype)
    v_ref[...] = v.astype(v_ref.dtype)


def fused_qkv(x_to, x_from, q_w, q_b, k_w, k_b, v_w, v_b):
    """Single pallas_call computing
         Q = x_to   @ q_w + q_b
         K = x_from @ k_w + k_b
         V = x_from @ v_w + v_b
       with exact-width (latent_dim) outputs.  Returns (Q, K, V)."""
    *lead_to, d_to = x_to.shape
    *lead_from, d_from = x_from.shape
    d = q_w.shape[1]

    m_to = math.prod(lead_to) if lead_to else 1
    m_from = math.prod(lead_from) if lead_from else 1
    m_max = max(m_to, m_from)

    xt = x_to.reshape(m_to, d_to)
    xf = x_from.reshape(m_from, d_from)
    # Only pad M when the two token streams disagree (they share one grid).
    if m_to < m_max:
        xt = jnp.pad(xt, ((0, m_max - m_to), (0, 0)))
    if m_from < m_max:
        xf = jnp.pad(xf, ((0, m_max - m_from), (0, 0)))

    sub = _sublane(x_to.dtype)
    # Biggest tile <= _MAX_TILE_M that still yields grid >= 2 (v7x dual-core),
    # rounded to the dtype's sublane granule.
    tile = min(_MAX_TILE_M, max(sub, _round_up(pl.cdiv(m_max, 2), sub)))
    grid_m = pl.cdiv(m_max, tile)

    itemsize = jnp.dtype(x_to.dtype).itemsize
    cost = pl.CostEstimate(
        flops=2 * m_max * d * (d_to + 2 * d_from),
        transcendentals=0,
        bytes_accessed=itemsize * (xt.size + xf.size + q_w.size + k_w.size
                                   + v_w.size + 3 * d + 3 * m_max * d),
    )

    q, k, v = pl.pallas_call(
        _fused_qkv_kernel,
        out_shape=(
            jax.ShapeDtypeStruct((m_max, d), x_to.dtype),
            jax.ShapeDtypeStruct((m_max, d), x_from.dtype),
            jax.ShapeDtypeStruct((m_max, d), x_from.dtype),
        ),
        grid=(grid_m,),
        in_specs=[
            pl.BlockSpec((tile, d_to), lambda i: (i, 0)),     # X_to tile
            pl.BlockSpec((tile, d_from), lambda i: (i, 0)),   # X_from tile
            pl.BlockSpec((d_to, d), lambda i: (0, 0)),        # q_w (VMEM-resident)
            pl.BlockSpec((d_from, d), lambda i: (0, 0)),      # k_w
            pl.BlockSpec((d_from, d), lambda i: (0, 0)),      # v_w
            pl.BlockSpec((1, d), lambda i: (0, 0)),           # q_b
            pl.BlockSpec((1, d), lambda i: (0, 0)),           # k_b
            pl.BlockSpec((1, d), lambda i: (0, 0)),           # v_b
        ],
        out_specs=(
            pl.BlockSpec((tile, d), lambda i: (i, 0)),
            pl.BlockSpec((tile, d), lambda i: (i, 0)),
            pl.BlockSpec((tile, d), lambda i: (i, 0)),
        ),
        compiler_params=pltpu.CompilerParams(
            dimension_semantics=("parallel",)),
        cost_estimate=cost,
    )(xt, xf, q_w, k_w, v_w,
      q_b.reshape(1, d), k_b.reshape(1, d), v_b.reshape(1, d))

    # Row slices are no-ops when m_to == m_from == m_max (the common case).
    Q = q[:m_to].reshape(*lead_to, d)
    K = k[:m_from].reshape(*lead_from, d)
    V = v[:m_from].reshape(*lead_from, d)
    return Q, K, V


class TokensToQKVPallas:
    """JAX/Pallas equivalent of the PyTorch TokensToQKV module."""

    def __init__(self, to_dim, from_dim, latent_dim, key):
        kq_w, kq_b, kk_w, kk_b, kv_w, kv_b = jax.random.split(key, 6)

        def init_linear(wkey, bkey, fan_in, fan_out):
            # PyTorch nn.Linear default init: U(-1/sqrt(fan_in), 1/sqrt(fan_in))
            bound = 1.0 / float(fan_in) ** 0.5
            # stored as (fan_in, fan_out) so the kernel does x @ W
            w = jax.random.uniform(
                wkey, (fan_in, fan_out), jnp.float32, -bound, bound)
            b = jax.random.uniform(bkey, (fan_out,), jnp.float32, -bound, bound)
            return w, b

        self.q_w, self.q_b = init_linear(kq_w, kq_b, to_dim, latent_dim)
        self.k_w, self.k_b = init_linear(kk_w, kk_b, from_dim, latent_dim)
        self.v_w, self.v_b = init_linear(kv_w, kv_b, from_dim, latent_dim)
        self.latent_dim = latent_dim

        # One jitted program: reshape/slice + pallas_call fused, no eager
        # dispatch overhead around the custom call.
        self._fwd = jax.jit(fused_qkv)

    def __call__(self, X_to, X_from):
        return self._fwd(X_to, X_from,
                         self.q_w, self.q_b,
                         self.k_w, self.k_b,
                         self.v_w, self.v_b)


if __name__ == "__main__":
    key = jax.random.PRNGKey(0)
    k_params, k_to, k_from = jax.random.split(key, 3)

    batch = 2
    seq_to = 8
    seq_from = 8

    X_to = jax.random.normal(k_to, (batch, seq_to, to_dim), jnp.float32)
    X_from = jax.random.normal(k_from, (batch, seq_from, from_dim), jnp.float32)

    module = TokensToQKVPallas(to_dim, from_dim, latent_dim, k_params)

    Q, K, V = module(X_to, X_from)
    jax.block_until_ready((Q, K, V))

    # Cross-check against plain-JAX reference.
    Q_ref = X_to @ module.q_w + module.q_b
    K_ref = X_from @ module.k_w + module.k_b
    V_ref = X_from @ module.v_w + module.v_b
    assert Q.shape == (batch, seq_to, latent_dim)
    assert K.shape == (batch, seq_from, latent_dim)
    assert V.shape == (batch, seq_from, latent_dim)
    assert jnp.allclose(Q, Q_ref, atol=1e-5)
    assert jnp.allclose(K, K_ref, atol=1e-5)
    assert jnp.allclose(V, V_ref, atol=1e-5)

    print("KERNEL_OK")
</pallas_src>

<mosaic_0001>
module attributes {stable_mosaic.version = 11 : i64} {
  func.func @_fused_qkv_kernel(%arg0: i32, %arg1: memref<8x5xf32, #tpu.memory_space<vmem>>, %arg2: memref<8x6xf32, #tpu.memory_space<vmem>>, %arg3: memref<5x10xf32, #tpu.memory_space<vmem>>, %arg4: memref<6x10xf32, #tpu.memory_space<vmem>>, %arg5: memref<6x10xf32, #tpu.memory_space<vmem>>, %arg6: memref<1x10xf32, #tpu.memory_space<vmem>>, %arg7: memref<1x10xf32, #tpu.memory_space<vmem>>, %arg8: memref<1x10xf32, #tpu.memory_space<vmem>>, %arg9: memref<8x10xf32, #tpu.memory_space<vmem>>, %arg10: memref<8x10xf32, #tpu.memory_space<vmem>>, %arg11: memref<8x10xf32, #tpu.memory_space<vmem>>) attributes {dimension_semantics = [#tpu.dimension_semantics<parallel>], iteration_bounds = array<i64: 2>, scalar_prefetch = 0 : i64, scratch_operands = 0 : i64, tpu.core_type = #tpu.core_type<tc>, window_params = [{transform_indices = @transform_0, window_bounds = array<i64: 8, 5>}, {transform_indices = @transform_1, window_bounds = array<i64: 8, 6>}, {pipeline_mode = #tpu.pipeline_mode<synchronous>, transform_indices = @transform_2, window_bounds = array<i64: 5, 10>}, {pipeline_mode = #tpu.pipeline_mode<synchronous>, transform_indices = @transform_3, window_bounds = array<i64: 6, 10>}, {pipeline_mode = #tpu.pipeline_mode<synchronous>, transform_indices = @transform_4, window_bounds = array<i64: 6, 10>}, {pipeline_mode = #tpu.pipeline_mode<synchronous>, transform_indices = @transform_5, window_bounds = array<i64: 1, 10>}, {pipeline_mode = #tpu.pipeline_mode<synchronous>, transform_indices = @transform_6, window_bounds = array<i64: 1, 10>}, {pipeline_mode = #tpu.pipeline_mode<synchronous>, transform_indices = @transform_7, window_bounds = array<i64: 1, 10>}, {transform_indices = @transform_8, window_bounds = array<i64: 8, 10>}, {transform_indices = @transform_9, window_bounds = array<i64: 8, 10>}, {transform_indices = @transform_10, window_bounds = array<i64: 8, 10>}]} {
    %c0 = arith.constant 0 : index
    %c0_0 = arith.constant 0 : index
    %0 = vector.load %arg1[%c0, %c0_0] : memref<8x5xf32, #tpu.memory_space<vmem>>, vector<8x5xf32>
    %c0_1 = arith.constant 0 : index
    %c0_2 = arith.constant 0 : index
    %1 = vector.load %arg2[%c0_1, %c0_2] : memref<8x6xf32, #tpu.memory_space<vmem>>, vector<8x6xf32>
    %c0_3 = arith.constant 0 : index
    %c0_4 = arith.constant 0 : index
    %2 = vector.load %arg3[%c0_3, %c0_4] : memref<5x10xf32, #tpu.memory_space<vmem>>, vector<5x10xf32>
    %cst = arith.constant dense<0.000000e+00> : vector<8x10xf32>
    %3 = tpu.matmul %0, %2, %cst {dimension_numbers = #tpu.dot_dimension_numbers<[1], [0], [0], [1], [0, 0, 1, 1], [], []>} : vector<8x5xf32>, vector<5x10xf32>, vector<8x10xf32> -> vector<8x10xf32>
    %c0_5 = arith.constant 0 : index
    %c0_6 = arith.constant 0 : index
    %4 = vector.load %arg6[%c0_5, %c0_6] : memref<1x10xf32, #tpu.memory_space<vmem>>, vector<1x10xf32>
    %5 = vector.broadcast %4 : vector<1x10xf32> to vector<8x10xf32>
    %6 = arith.addf %3, %5 : vector<8x10xf32>
    %c0_7 = arith.constant 0 : index
    %c0_8 = arith.constant 0 : index
    %7 = vector.load %arg4[%c0_7, %c0_8] : memref<6x10xf32, #tpu.memory_space<vmem>>, vector<6x10xf32>
    %cst_9 = arith.constant dense<0.000000e+00> : vector<8x10xf32>
    %8 = tpu.matmul %1, %7, %cst_9 {dimension_numbers = #tpu.dot_dimension_numbers<[1], [0], [0], [1], [0, 0, 1, 1], [], []>} : vector<8x6xf32>, vector<6x10xf32>, vector<8x10xf32> -> vector<8x10xf32>
    %c0_10 = arith.constant 0 : index
    %c0_11 = arith.constant 0 : index
    %9 = vector.load %arg7[%c0_10, %c0_11] : memref<1x10xf32, #tpu.memory_space<vmem>>, vector<1x10xf32>
    %10 = vector.broadcast %9 : vector<1x10xf32> to vector<8x10xf32>
    %11 = arith.addf %8, %10 : vector<8x10xf32>
    %c0_12 = arith.constant 0 : index
    %c0_13 = arith.constant 0 : index
    %12 = vector.load %arg5[%c0_12, %c0_13] : memref<6x10xf32, #tpu.memory_space<vmem>>, vector<6x10xf32>
    %cst_14 = arith.constant dense<0.000000e+00> : vector<8x10xf32>
    %13 = tpu.matmul %1, %12, %cst_14 {dimension_numbers = #tpu.dot_dimension_numbers<[1], [0], [0], [1], [0, 0, 1, 1], [], []>} : vector<8x6xf32>, vector<6x10xf32>, vector<8x10xf32> -> vector<8x10xf32>
    %c0_15 = arith.constant 0 : index
    %c0_16 = arith.constant 0 : index
    %14 = vector.load %arg8[%c0_15, %c0_16] : memref<1x10xf32, #tpu.memory_space<vmem>>, vector<1x10xf32>
    %15 = vector.broadcast %14 : vector<1x10xf32> to vector<8x10xf32>
    %16 = arith.addf %13, %15 : vector<8x10xf32>
    %c0_17 = arith.constant 0 : index
    %c0_18 = arith.constant 0 : index
    %17 = vector.load %arg9[%c0_17, %c0_18] : memref<8x10xf32, #tpu.memory_space<vmem>>, vector<8x10xf32>
    tpu.vector_store %arg9[%c0_17, %c0_18], %6 {strides = array<i32>} : memref<8x10xf32, #tpu.memory_space<vmem>>, vector<8x10xf32>,
    %c0_19 = arith.constant 0 : index
    %c0_20 = arith.constant 0 : index
    %18 = vector.load %arg10[%c0_19, %c0_20] : memref<8x10xf32, #tpu.memory_space<vmem>>, vector<8x10xf32>
    tpu.vector_store %arg10[%c0_19, %c0_20], %11 {strides = array<i32>} : memref<8x10xf32, #tpu.memory_space<vmem>>, vector<8x10xf32>,
    %c0_21 = arith.constant 0 : index
    %c0_22 = arith.constant 0 : index
    %19 = vector.load %arg11[%c0_21, %c0_22] : memref<8x10xf32, #tpu.memory_space<vmem>>, vector<8x10xf32>
    tpu.vector_store %arg11[%c0_21, %c0_22], %16 {strides = array<i32>} : memref<8x10xf32, #tpu.memory_space<vmem>>, vector<8x10xf32>,
    return
  }
  func.func @transform_0(%arg0: i32) -> (i32, i32) {
    %c0_i32 = arith.constant 0 : i32
    %c0_i32_0 = arith.constant 0 : i32
    return %arg0, %c0_i32 : i32, i32
  }
  func.func @transform_1(%arg0: i32) -> (i32, i32) {
    %c0_i32 = arith.constant 0 : i32
    %c0_i32_0 = arith.constant 0 : i32
    return %arg0, %c0_i32 : i32, i32
  }
  func.func @transform_2(%arg0: i32) -> (i32, i32) {
    %c0_i32 = arith.constant 0 : i32
    %c0_i32_0 = arith.constant 0 : i32
    %c0_i32_1 = arith.constant 0 : i32
    return %c0_i32, %c0_i32_0 : i32, i32
  }
  func.func @transform_3(%arg0: i32) -> (i32, i32) {
    %c0_i32 = arith.constant 0 : i32
    %c0_i32_0 = arith.constant 0 : i32
    %c0_i32_1 = arith.constant 0 : i32
    return %c0_i32, %c0_i32_0 : i32, i32
  }
  func.func @transform_4(%arg0: i32) -> (i32, i32) {
    %c0_i32 = arith.constant 0 : i32
    %c0_i32_0 = arith.constant 0 : i32
    %c0_i32_1 = arith.constant 0 : i32
    return %c0_i32, %c0_i32_0 : i32, i32
  }
  func.func @transform_5(%arg0: i32) -> (i32, i32) {
    %c0_i32 = arith.constant 0 : i32
    %c0_i32_0 = arith.constant 0 : i32
    %c0_i32_1 = arith.constant 0 : i32
    return %c0_i32, %c0_i32_0 : i32, i32
  }
  func.func @transform_6(%arg0: i32) -> (i32, i32) {
    %c0_i32 = arith.constant 0 : i32
    %c0_i32_0 = arith.constant 0 : i32
    %c0_i32_1 = arith.constant 0 : i32
    return %c0_i32, %c0_i32_0 : i32, i32
  }
  func.func @transform_7(%arg0: i32) -> (i32, i32) {
    %c0_i32 = arith.constant 0 : i32
    %c0_i32_0 = arith.constant 0 : i32
    %c0_i32_1 = arith.constant 0 : i32
    return %c0_i32, %c0_i32_0 : i32, i32
  }
  func.func @transform_8(%arg0: i32) -> (i32, i32) {
    %c0_i32 = arith.constant 0 : i32
    %c0_i32_0 = arith.constant 0 : i32
    return %arg0, %c0_i32 : i32, i32
  }
  func.func @transform_9(%arg0: i32) -> (i32, i32) {
    %c0_i32 = arith.constant 0 : i32
    %c0_i32_0 = arith.constant 0 : i32
    return %arg0, %c0_i32 : i32, i32
  }
  func.func @transform_10(%arg0: i32) -> (i32, i32) {
    %c0_i32 = arith.constant 0 : i32
    %c0_i32_0 = arith.constant 0 : i32
    return %arg0, %c0_i32 : i32, i32
  }
}

</mosaic_0001>

<bundles_post_ra>
// kernel: fused_qkv.1
= control target key start
LH: loop header
LB: loop body
LE: loop exit
PB: predicated region body
PF: predicated region fallthrough
CT: control target
= control target key end

     0   :  { %s1117_s0 = inlined_call_operand.vmem [shape: f32[16,5], index: 0, kind: input, shape index: {}]   ;;  %s1118_s1 = inlined_call_operand.vmem [shape: f32[16,6], index: 1, kind: input, shape index: {}]   ;;  %s1119_s2 = inlined_call_operand.vmem [shape: f32[5,10], index: 2, kind: input, shape index: {}]   ;;  %s1120_s3 = inlined_call_operand.vmem [shape: f32[6,10], index: 3, kind: input, shape index: {}]   ;;  %s1121_s4 = inlined_call_operand.vmem [shape: f32[6,10], index: 4, kind: input, shape index: {}]   ;;  %s1122_s5 = inlined_call_operand.vmem [shape: f32[1,10], index: 5, kind: input, shape index: {}]   ;;  %s1123_s6 = inlined_call_operand.vmem [shape: f32[1,10], index: 6, kind: input, shape index: {}]   ;;  %s1124_s7 = inlined_call_operand.vmem [shape: f32[1,10], index: 7, kind: input, shape index: {}]   ;;  %s1125_s8 = inlined_call_operand.hbm [shape: f32[16,10], index: 8, kind: output, shape index: {0}]   ;;  %s1126_s9 = inlined_call_operand.hbm [shape: f32[16,10], index: 9, kind: output, shape index: {1}]   ;;  %s1127_s10 = inlined_call_operand.hbm [shape: f32[16,10], index: 10, kind: output, shape index: {2}]  }
   0x1   :  { %1135 = sst [smem:[#allocation11_spill]] %s1117_s0 }
   0x2   :  { %1136 = sst [smem:[#allocation12_spill]] %s1118_s1 }
   0x3   :  { %1137 = sst [smem:[#allocation13_spill]] %s1119_s2 }
   0x4   :  { %1138 = sst [smem:[#allocation14_spill]] %s1120_s3 }
   0x5   :  { %1139 = sst [smem:[#allocation15_spill]] %s1121_s4 }
   0x6   :  { %1140 = sst [smem:[#allocation16_spill]] %s1122_s5 }
   0x7   :  { %16 = vsyncpa [#allocation3], 0 }
   0x8   :  { %18 = vsyncpa [#allocation3 + $0x1], 0 }
   0x9   :  { %19 = vsyncpa [#allocation5], 0 }
   0xa   :  { %21 = vsyncpa [#allocation5 + $0x1], 0  ;;  %s932_s13 = smov 0   ;;  %s934_s14 = smov 0  }
   0xb   :  { %s936_s15 = smov 0   ;;  %s938_s16 = smov 0  }
   0xc LB: > { %s953_s17 = sadd.s32 4294967295, %s875_s16   ;;  %s1128_s18 = sadd.s32 4294967294, %s875_s16   ;;  %s875_s16 = sphi %s938_s16, %s1163_s16   ;;  %s871_s15 = sphi %s936_s15, %s1162_s15   ;;  %s867_s14 = sphi %s934_s14, %s1161_s14   ;;  %s863_s13 = sphi %s932_s13, %s1160_s13  }
   0xd   : > { %s957_s19 = sadd.s32 1, %s875_s16   ;;  %s212_s20 = sadd.s32 1, %s871_s15 }
   0xe   : > { %s209_s21 = ssub.s32 %s875_s16, %s957_s19  ;;  %p222_p0 = scmp.ne.s32.totalorder %s871_s15, %s867_s14 }
   0xf   : > { %p210_p1 = scmp.eq.s32.totalorder %s209_s21, 0  ;;  %p223_p2 = scmp.eq.s32.totalorder %s953_s17, 1 }
  0x10   : > { %p228_p3 = scmp.ne.s32.totalorder %s867_s14, %s863_s13  ;;  %p229_p4 = scmp.eq.s32.totalorder %s1128_s18, 1 }
  0x11   : > { %s970_s22 = scalar_select %p210_p1, %s871_s15, %s212_s20  }
  0x12   : > { %p972_p5 = por %p223_p2, %p222_p0  ;;  %p976_p6 = por %p229_p4, %p228_p3 }
  0x13   : > { %p681_p7 = scmp.ge.s32.totalorder %s875_s16, 1  ;;  %p331_p8 = scmp.lt.s32.totalorder %s875_s16, 3 }
  0x15   : > { %p332_p9 = pnand %p681_p7, %p331_p8 }
  0x17   : > { %335 = sbr.rel (%p332_p9) target bundleno = 202 (0xca), region = 52 }
  0x1c   : > { %vm434_vm0 = vcmask 1045504   ;;  %s1143_s4 = sld [smem:[#allocation15_spill]]  ;;  %p382_p10 = scmp.lt.s32.totalorder %s953_s17, 1  ;;  %vm401_vm1 = vcmask 1044480   ;;  %vm430_vm2 = vcmask 48128   ;;  %vm397_vm3 = vcmask 39936  }
  0x1d   : > { %s1144_s3 = sld [smem:[#allocation14_spill]]  ;;  %s1129_s29 = sand.u32 1, %s867_s14   ;;  %v750_v5 = vld [vmem:[%s1123_s6] ss:$0 sm:$0xff]  ;;  %vm486_vm4 = vcmask 80896  }
  0x1e   : > { %s1145_s2 = sld [smem:[#allocation13_spill]]  ;;  %s1002_s30 = sshll.u32 %s1129_s29, 3  ;;  %v752_v11 = vld [vmem:[%s1124_s7] ss:$0 sm:$0xff] }
  0x1f   : > { %s383_s11 = scalar_select %p382_p10, %s953_s17, 1 }
  0x20   : > { %s1146_s1 = sld [smem:[#allocation12_spill]]  ;;  %s495_s20 = sand.u32 1, %s953_s17  }
  0x21   : > { %s685_s12 = sshll.u32 %s383_s11, 3  ;;  %s1147_s0 = sld [smem:[#allocation11_spill]] }
  0x22   : > { %v458_v0 = vld [vmem:[%s1143_s4] sm:$0x3f]  ;;  %s696_s11 = sshll.u32 %s953_s17, 3  ;;  %s1148_s5 = sld [smem:[#allocation16_spill]] }
  0x23   : > { %691 = vmatpush.msk.msra.mxu2 %vm434_vm0, %v458_v0  ;;  %v425_v1 = vld [vmem:[%s1144_s3] sm:$0x3f]  ;;  %s525_s26 = scalar_lea.hbm %s1126_s9, %s696_s11  ;;  %s1130_s18 = scalar_lea.vmem [#allocation2], %s1002_s30 }
  0x24   : > { %v392_v2 = vld [vmem:[%s1145_s2] sm:$0x1f]  ;;  %689 = vmatpush.msk.msra.mxu1 %vm434_vm0, %v425_v1  ;;  %s1021_s17 = sshll.u32 %s525_s26, 4  ;;  %s1026_s21 = sshll.u32 %s1130_s18, 4  ;;  %s530_s17 = int_to_ptr.hbm [resolvable:$true] %s1021_s17 }
  0x25   : > { %687 = vmatpush.msk.msra.mxu0 %vm401_vm1, %v392_v2  ;;  %1149 = sst [smem:[#allocation9_spill]] %s1026_s21  ;;  %s539_s3 = scalar_lea.hbm %s1127_s10, %s696_s11 }
  0x26   : > { %s389_s25 = scalar_lea.vmem %s1146_s1, %s685_s12  ;;  %s374_s1 = scalar_lea.vmem [#allocation4], %s1002_s30 }
  0x27   : > { %s385_s28 = scalar_lea.vmem %s1147_s0, %s685_s12  ;;  %v391_v3 = vld [vmem:[%s389_s25] sm:$0xff]  ;;  %s511_s25 = scalar_lea.hbm %s1125_s8, %s696_s11 }
  0x28   : > { %v390_v4 = vld [vmem:[%s385_s28] sm:$0xff]  ;;  %692 = vmatmul.msk.f32.vlgmr.msra.gmra.mxu2 %vm430_vm2, %v391_v3  ;;  %690 = vmatmul.msk.f32.vlgmr.msra.gmra.mxu1 %vm430_vm2, %v391_v3  ;;  %s1016_s29 = sshll.u32 %s374_s1, 4  ;;  %s1028_s0 = sshll.u32 %s511_s25, 4  ;;  %s528_s29 = int_to_ptr.vmem [resolvable:$true] %s1016_s29 }
  0x29   : > { %688 = vmatmul.msk.f32.vlgmr.msra.gmra.mxu0 %vm397_vm3, %v390_v4  ;;  %v751_v6 = vld [vmem:[%s1148_s5] ss:$0 sm:$0xff]  ;;  %1150 = sst [smem:[#allocation10_spill]] %s1028_s0  ;;  %s1134_s25 = scalar_lea.vmem [#allocation6], %s1002_s30 }
  0x2a   : > { %s1044_s28 = sshll.u32 %s1134_s25, 4  ;;  %s1046_s18 = sshll.u32 %s539_s3, 4  ;;  %s542_s28 = int_to_ptr.vmem [resolvable:$true] %s1044_s28  ;;  %s544_s18 = int_to_ptr.hbm [resolvable:$true] %s1046_s18 }
  0x2b   : > { %s1048_s11 = scalar_lea.sflag [#allocation5], %s495_s20  ;;  %s767_s12 = sshra.s32 %s530_s17, 4  ;;  %s768_s12 = int_to_ptr.hbm [resolvable:$true] %s767_s12 }
  0x2c   : > { %s769_s2 = scalar_lea.hbm %s768_s12, 8  ;;  %s773_s27 = scalar_lea.hbm %s1126_s9, 16 }
  0x2d   : > { %p770_p11 = scmp.ne.s32.totalorder %s768_s12, %s769_s2  ;;  %p774_p0 = scmp.lt.s32.totalorder %s768_s12, %s1126_s9 }
  0x2e   : > { %p775_p1 = scmp.lt.s32.totalorder %s773_s27, %s769_s2 }
  0x2f   : > { %p771_p12 = pnand %p770_p11, %p972_p5 }
  0x30   : > { %p776_p2 = por %p775_p1, %p774_p0 }
  0x31   : > { %p772_p13 = pneg %p771_p12 }
  0x33   : > { %p777_p3 = pnand %p776_p2, %p772_p13 }
  0xa5   : > { %v455_v7 = vpop.f32.mrf.mxu1 }
  0xa6   : > { %v456_v8 = vadd.f32 %v750_v5, %v455_v7  ;;  %v422_v9 = vpop.f32.mrf.mxu0 }
  0xa7   : > { %v423_v10 = vadd.f32 %v751_v6, %v422_v9 }
  0xa8   : > { %488 = vst.msk [vmem:[%s374_s1] sm:$0xff] %vm486_vm4, %v456_v8 }
  0xa9   : > { %780 = shalt.err (!%p777_p3)
}
  0xaa   : > { %s1151_s20 = sld [smem:[#allocation10_spill]]  ;;  %s1152_s3 = scalar_lea.vmem [#allocation2], %s1002_s30 }
  0xab   : > { %702 = dma.vmem_to_hbm [thread:$0]  (%p972_p5), %s528_s29, 128, %s530_s17, %s1048_s11   ;;  %487 = vst.msk [vmem:[%s1152_s3] sm:$0xff] %vm486_vm4, %v423_v10 }
  0xac   : > { %s1153_s21 = sand.u32 1, %s867_s14   ;;  %s801_s1 = scalar_lea.hbm %s1125_s8, 16 }
  0xad   : > { %s491_s26 = scalar_lea.sflag [#allocation3], %s1153_s21 }
  0xb0   : > { %s1154_s25 = int_to_ptr.hbm [resolvable:$true] %s1151_s20 }
  0xb1   : > { %s795_s0 = sshra.s32 %s1154_s25, 4  ;;  %s796_s0 = int_to_ptr.hbm [resolvable:$true] %s795_s0 }
  0xb2   : > { %s797_s12 = scalar_lea.hbm %s796_s0, 8  ;;  %p802_p9 = scmp.lt.s32.totalorder %s796_s0, %s1125_s8 }
  0xb3   : > { %p798_p4 = scmp.ne.s32.totalorder %s796_s0, %s797_s12  ;;  %p803_p10 = scmp.lt.s32.totalorder %s801_s1, %s797_s12 }
  0xb5   : > { %p799_p7 = pnand %p798_p4, %p972_p5  ;;  %p804_p11 = por %p803_p10, %p802_p9 }
  0xb7   : > { %p800_p8 = pneg %p799_p7 }
  0xb9   : > { %p805_p12 = pnand %p804_p11, %p800_p8 }
  0xbb   : > { %808 = shalt.err (!%p805_p12)
}
  0xbc   : > { %s1155_s29 = smov %s1154_s25  ;;  %s1156_s17 = sld [smem:[#allocation9_spill]]  ;;  %v483_v12 = vpop.f32.mrf.mxu2 }
  0xbd   : > { %v484_v13 = vadd.f32 %v752_v11, %v483_v12  ;;  %s1158_s4 = scalar_lea.vmem [#allocation6], %s1002_s30  ;;  %s823_s5 = sshra.s32 %s544_s18, 4  ;;  %s824_s5 = int_to_ptr.hbm [resolvable:$true] %s823_s5 }
  0xbe   : > { %s825_s3 = scalar_lea.hbm %s824_s5, 8  ;;  %s829_s0 = scalar_lea.hbm %s1127_s10, 16 }
  0xbf   : > { %489 = vst.msk [vmem:[%s1158_s4] sm:$0xff] %vm486_vm4, %v484_v13  ;;  %p826_p13 = scmp.ne.s32.totalorder %s824_s5, %s825_s3  ;;  %p830_p2 = scmp.lt.s32.totalorder %s824_s5, %s1127_s10 }
  0xc0   : > { %p831_p3 = scmp.lt.s32.totalorder %s829_s0, %s825_s3 }
  0xc1   : > { %p827_p0 = pnand %p826_p13, %p972_p5 }
  0xc2   : > { %s1157_s25 = int_to_ptr.vmem [resolvable:$true] %s1156_s17  ;;  %p832_p4 = por %p831_p3, %p830_p2 }
  0xc3   : > { %701 = dma.vmem_to_hbm [thread:$0]  (%p972_p5), %s1157_s25, 128, %s1155_s29, %s491_s26  }
  0xc4   : > { %p828_p1 = pneg %p827_p0 }
  0xc6   : > { %p833_p7 = pnand %p832_p4, %p828_p1 }
  0xc8   : > { %836 = shalt.err (!%p833_p7)
}
  0xc9   : > { %703 = dma.vmem_to_hbm [thread:$0]  (%p972_p5), %s542_s28, 128, %s544_s18, %s1048_s11  }
  0xca PF: > { %p717_p8 = scmp.ge.s32.totalorder %s875_s16, 2  ;;  %s555_s30 = sand.u32 1, %s863_s13  }
  0xcb   : > { %s556_s2 = scalar_lea.sflag [#allocation3], %s555_s30 }
  0xcc   : > { %p708_p9 = pnand %p717_p8, %p976_p6 }
  0xce   : > { %p709_p10 = pneg %p708_p9 }
  0xd0   : > { %854 = dma.done.wait (%p709_p10), %s556_s2, 128  }
  0xd1   : > { %856 = vsyncadd (%p709_p10), %s556_s2, 4294967168  ;;  %s1159_s27 = sadd.s32 4294967294, %s875_s16  }
  0xd2   : > { %s565_s1 = sand.u32 1, %s1159_s27  }
  0xd3   : > { %s566_s29 = scalar_lea.sflag [#allocation5], %s565_s1 }
  0xd4   : > { %858 = dma.done.wait (%p709_p10), %s566_s29, 256  }
  0xd5   : > { %860 = vsyncadd (%p709_p10), %s566_s29, 4294967040  ;;  %p24_p5 = scmp.ge.s32.totalorder %s957_s19, 4   ;;  %s1160_s13 = smov %s867_s14 }
  0xd6   : > { %s1161_s14 = smov %s871_s15  ;;  %s1162_s15 = smov %s970_s22 }
  0xd7   : > { %s1163_s16 = smov %s957_s19  ;;  %26 = sbr.rel (!%p24_p5) target bundleno = 12 (0xc), region = 122 }
  0xdc   :  { %582 = vsyncpa [#allocation3], 1 }
  0xdd   :  { %584 = vsyncpa [#allocation3 + $0x1], 1 }
  0xde   :  { %585 = vsyncpa [#allocation5], 1 }
  0xdf   :  { %587 = vsyncpa [#allocation5 + $0x1], 1 }

</bundles_post_ra>
